<compile_context>
chip_gen: v7x
topology: tpu7x:2x2x1
jax: 0.10.0
libtpu: 0.0.40
codegen_flags: <defaults>
</compile_context>

<pallas_src>
import functools

import jax
import jax.numpy as jnp
from jax import lax
from jax.experimental import pallas as pl
from jax.experimental.pallas import tpu as pltpu


def _cosine_sim_kernel(x_ref, y_ref, invx_ref, invy_ref, o_ref):
    # x_ref: (TM, H), y_ref: (TN, H), invx_ref: (TM, 1), invy_ref: (1, TN),
    # o_ref: (TM, TN).
    # Pairwise dot products on the MXU, contracting the last axis of both
    # operands (native transposed-RHS matmul; no explicit y.T copy).
    dots = lax.dot_general(
        x_ref[...], y_ref[...],
        dimension_numbers=(((1,), (1,)), ((), ())),
        preferred_element_type=jnp.float32,
    )                                                   # (TM, TN) f32
    # Epilogue: two broadcast multiplies (inv_temp is folded into invx).
    o_ref[...] = (dots * invy_ref[...] * invx_ref[...]).astype(o_ref.dtype)


def _round_up(v, m):
    return ((v + m - 1) // m) * m


def _vmem_capacity_bytes():
    try:
        info = pltpu.get_tpu_info()
        cap = getattr(info, "vmem_capacity_bytes", None)
        if cap:
            return int(cap)
    except Exception:
        pass
    # Conservative fallback: v7x per-TensorCore VMEM.
    return 64 * 1024 * 1024


def similarity(x, y, temp, *, tile_m=None, tile_n=256, eps=1e-8):
    """Pallas equivalent of Similarity(temp)(x, y).

    Accepts either:
      x: (Bx, 1, H), y: (1, By, H)   (the SimCSE broadcast convention), or
      x: (Bx, H),    y: (By, H)
    Returns (Bx, By) float32 cosine similarities divided by `temp`.
    """
    if x.ndim == 3:
        assert x.shape[1] == 1, "expected x of shape (Bx, 1, H)"
        x2d = x[:, 0, :]
    else:
        x2d = x
    if y.ndim == 3:
        assert y.shape[0] == 1, "expected y of shape (1, By, H)"
        y2d = y[0, :, :]
    else:
        y2d = y

    bx, h = x2d.shape
    by, h2 = y2d.shape
    assert h == h2, "feature dims must match"

    # ---- generation-aware VMEM budget --------------------------------------
    vmem_cap = _vmem_capacity_bytes()
    if vmem_cap >= 96 * 1024 * 1024:
        # v5e / v6e: 128 MiB physical VMEM -> big resident x panel.
        budget = 56 * 1024 * 1024
        vmem_limit = 96 * 1024 * 1024
        default_tm = 512
    else:
        # v7x: 64 MiB per TensorCore -> keep headroom for double-buffering.
        budget = 28 * 1024 * 1024
        vmem_limit = 48 * 1024 * 1024
        default_tm = 256
    if tile_m is None:
        tile_m = default_tm

    # ---- choose tile sizes (lane-dense output, VMEM-bounded) ---------------
    h_pad = _round_up(h, 128)
    tm = min(tile_m, _round_up(bx, 8))      # sublane axis: multiple of 8
    tn = min(tile_n, _round_up(by, 128))    # lane axis: multiple of 128

    itemsize = jnp.dtype(x2d.dtype).itemsize

    def _vmem_bytes(tm_, tn_):
        # 2-deep pipelining on the feature tiles and the output tile, plus the
        # (tiny) inverse-norm vectors.
        in_bytes = 2 * (tm_ + tn_) * h_pad * itemsize
        out_bytes = 2 * tm_ * tn_ * 4
        norm_bytes = 2 * (tm_ + tn_) * 4
        return in_bytes + out_bytes + norm_bytes

    # Shrink priority: tn first (keeps the x panel tall so y is re-streamed
    # from HBM fewer times), tm only as a last resort; keep tn a multiple of
    # 256 (full MXU width on v6e/v7x) until tm has been reduced as well.
    while _vmem_bytes(tm, tn) > budget:
        if tn > 256:
            tn //= 2
        elif tm > 256:
            tm //= 2
        elif tn > 128:
            tn //= 2
        elif tm > 8:
            tm //= 2
        else:
            break

    bx_pad = _round_up(bx, tm)
    by_pad = _round_up(by, tn)

    # ---- pad inputs (zero rows -> zero inv-norm -> zero sim; cropped) ------
    xp = x2d
    if (bx_pad, h_pad) != (bx, h):
        xp = jnp.pad(x2d, ((0, bx_pad - bx), (0, h_pad - h)))
    yp = y2d
    if (by_pad, h_pad) != (by, h):
        yp = jnp.pad(y2d, ((0, by_pad - by), (0, h_pad - h)))

    # ---- precompute inverse norms in f32 (inv_temp folded into x side) -----
    x32 = x2d.astype(jnp.float32)
    y32 = y2d.astype(jnp.float32)
    x_norm = jnp.sqrt(jnp.sum(x32 * x32, axis=-1))            # (Bx,)
    y_norm = jnp.sqrt(jnp.sum(y32 * y32, axis=-1))            # (By,)
    inv_x = (1.0 / float(temp)) / jnp.maximum(x_norm, eps)    # (Bx,)
    inv_y = 1.0 / jnp.maximum(y_norm, eps)                    # (By,)
    inv_x = jnp.pad(inv_x, (0, bx_pad - bx)).reshape(bx_pad, 1)
    inv_y = jnp.pad(inv_y, (0, by_pad - by)).reshape(1, by_pad)

    grid = (bx_pad // tm, by_pad // tn)

    cost = pl.CostEstimate(
        flops=2 * bx_pad * by_pad * h_pad,
        transcendentals=0,
        # x is resident across the inner j loop; y is re-streamed once per
        # outer i iteration.
        bytes_accessed=itemsize * (bx_pad * h_pad + grid[0] * by_pad * h_pad)
        + 4 * (bx_pad * by_pad + bx_pad + by_pad),
    )

    out_padded = pl.pallas_call(
        _cosine_sim_kernel,
        out_shape=jax.ShapeDtypeStruct((bx_pad, by_pad), jnp.float32),
        grid_spec=pltpu.PrefetchScalarGridSpec(
            num_scalar_prefetch=0,
            grid=grid,
            in_specs=[
                pl.BlockSpec((tm, h_pad), lambda i, j: (i, 0)),
                pl.BlockSpec((tn, h_pad), lambda i, j: (j, 0)),
                pl.BlockSpec((tm, 1), lambda i, j: (i, 0)),
                pl.BlockSpec((1, tn), lambda i, j: (0, j)),
            ],
            out_specs=pl.BlockSpec((tm, tn), lambda i, j: (i, j)),
        ),
        compiler_params=pltpu.CompilerParams(
            dimension_semantics=("parallel", "parallel"),
            vmem_limit_bytes=vmem_limit,
        ),
        cost_estimate=cost,
    )(xp, yp, inv_x, inv_y)

    return out_padded[:bx, :by]


def _reference(x, y, temp, eps=1e-8):
    # Pure-JAX reference matching torch.nn.CosineSimilarity(dim=-1)(x, y) / temp
    # with broadcasting x (Bx,1,H) vs y (1,By,H) and per-vector eps clamping.
    dots = jnp.sum(x * y, axis=-1)
    nx = jnp.maximum(jnp.sqrt(jnp.sum(x * x, axis=-1)), eps)
    ny = jnp.maximum(jnp.sqrt(jnp.sum(y * y, axis=-1)), eps)
    return dots / (nx * ny) / temp


if __name__ == "__main__":
    temp = 0.05  # deterministic hyperparameter (module has no learned weights)

    key = jax.random.PRNGKey(0)
    kx, ky = jax.random.split(key)
    Bx, By, H = 8, 8, 32
    # SimCSE-style broadcast shapes: x (Bx, 1, H), y (1, By, H)
    x = jax.random.normal(kx, (Bx, 1, H), dtype=jnp.float32)
    y = jax.random.normal(ky, (1, By, H), dtype=jnp.float32)

    out = similarity(x, y, temp)
    out = jax.block_until_ready(out)

    ref = _reference(x, y, temp)
    assert out.shape == (Bx, By)
    assert jnp.allclose(out, ref, atol=1e-4, rtol=1e-4), "mismatch vs reference"

    print("KERNEL_OK")
</pallas_src>

<mosaic_0001>
module attributes {stable_mosaic.version = 11 : i64} {
  func.func @_cosine_sim_kernel(%arg0: i32, %arg1: i32, %arg2: memref<8x128xf32, #tpu.memory_space<vmem>>, %arg3: memref<128x128xf32, #tpu.memory_space<vmem>>, %arg4: memref<8x1xf32, #tpu.memory_space<vmem>>, %arg5: memref<1x128xf32, #tpu.memory_space<vmem>>, %arg6: memref<8x128xf32, #tpu.memory_space<vmem>>) attributes {dimension_semantics = [#tpu.dimension_semantics<parallel>, #tpu.dimension_semantics<parallel>], iteration_bounds = array<i64: 1, 1>, scalar_prefetch = 0 : i64, scratch_operands = 0 : i64, tpu.core_type = #tpu.core_type<tc>, window_params = [{transform_indices = @transform_0, window_bounds = array<i64: 8, 128>}, {transform_indices = @transform_1, window_bounds = array<i64: 128, 128>}, {transform_indices = @transform_2, window_bounds = array<i64: 8, 1>}, {transform_indices = @transform_3, window_bounds = array<i64: 1, 128>}, {transform_indices = @transform_4, window_bounds = array<i64: 8, 128>}]} {
    %c0 = arith.constant 0 : index
    %c0_0 = arith.constant 0 : index
    %0 = vector.load %arg2[%c0, %c0_0] : memref<8x128xf32, #tpu.memory_space<vmem>>, vector<8x128xf32>
    %c0_1 = arith.constant 0 : index
    %c0_2 = arith.constant 0 : index
    %1 = vector.load %arg3[%c0_1, %c0_2] : memref<128x128xf32, #tpu.memory_space<vmem>>, vector<128x128xf32>
    %cst = arith.constant dense<0.000000e+00> : vector<8x128xf32>
    %2 = tpu.matmul %0, %1, %cst {dimension_numbers = #tpu.dot_dimension_numbers<[1], [1], [0], [0], [0, 0, 1, 0], [], []>} : vector<8x128xf32>, vector<128x128xf32>, vector<8x128xf32> -> vector<8x128xf32>
    %c0_3 = arith.constant 0 : index
    %c0_4 = arith.constant 0 : index
    %3 = vector.load %arg5[%c0_3, %c0_4] : memref<1x128xf32, #tpu.memory_space<vmem>>, vector<1x128xf32>
    %4 = vector.broadcast %3 : vector<1x128xf32> to vector<8x128xf32>
    %5 = arith.mulf %2, %4 : vector<8x128xf32>
    %c0_5 = arith.constant 0 : index
    %c0_6 = arith.constant 0 : index
    %6 = vector.load %arg4[%c0_5, %c0_6] : memref<8x1xf32, #tpu.memory_space<vmem>>, vector<8x1xf32>
    %7 = vector.broadcast %6 : vector<8x1xf32> to vector<8x128xf32>
    %8 = arith.mulf %5, %7 : vector<8x128xf32>
    %c0_7 = arith.constant 0 : index
    %c0_8 = arith.constant 0 : index
    %9 = vector.load %arg6[%c0_7, %c0_8] : memref<8x128xf32, #tpu.memory_space<vmem>>, vector<8x128xf32>
    tpu.vector_store %arg6[%c0_7, %c0_8], %8 {strides = array<i32>} : memref<8x128xf32, #tpu.memory_space<vmem>>, vector<8x128xf32>,
    return
  }
  func.func @transform_0(%arg0: i32, %arg1: i32) -> (i32, i32) {
    %c0_i32 = arith.constant 0 : i32
    %c0_i32_0 = arith.constant 0 : i32
    return %arg0, %c0_i32 : i32, i32
  }
  func.func @transform_1(%arg0: i32, %arg1: i32) -> (i32, i32) {
    %c0_i32 = arith.constant 0 : i32
    %c0_i32_0 = arith.constant 0 : i32
    return %arg1, %c0_i32 : i32, i32
  }
  func.func @transform_2(%arg0: i32, %arg1: i32) -> (i32, i32) {
    %c0_i32 = arith.constant 0 : i32
    %c0_i32_0 = arith.constant 0 : i32
    return %arg0, %c0_i32 : i32, i32
  }
  func.func @transform_3(%arg0: i32, %arg1: i32) -> (i32, i32) {
    %c0_i32 = arith.constant 0 : i32
    %c0_i32_0 = arith.constant 0 : i32
    return %c0_i32, %arg1 : i32, i32
  }
  func.func @transform_4(%arg0: i32, %arg1: i32) -> (i32, i32) {
    %c0_i32 = arith.constant 0 : i32
    return %arg0, %arg1 : i32, i32
  }
}

</mosaic_0001>

<bundles_post_ra>
// kernel: tpu_custom_call.1
= control target key start
LH: loop header
LB: loop body
LE: loop exit
PB: predicated region body
PF: predicated region fallthrough
CT: control target
= control target key end

     0   :  { %9 = vsyncpa [#allocation3], 0  ;;  %s350_s0 = inlined_call_operand.vmem [shape: f32[8,128], index: 0, kind: input, shape index: {}]   ;;  %s351_s1 = inlined_call_operand.hbm [shape: f32[128,128], index: 1, kind: input, shape index: {}]   ;;  %s352_s2 = inlined_call_operand.vmem [shape: f32[8,1], index: 2, kind: input, shape index: {}]   ;;  %s353_s3 = inlined_call_operand.vmem [shape: f32[1,128], index: 3, kind: input, shape index: {}]   ;;  %s354_s4 = inlined_call_operand.hbm [shape: f32[8,128], index: 4, kind: output, shape index: {}]  }
   0x1   :  { %10 = vsyncpa [#allocation4], 0  ;;  %s284_s15 = smov [#allocation2]   ;;  %s236_s19 = scalar_lea.hbm %s351_s1, 2048 }
   0x2   :  { %s18_s16 = sshll.u32 %s284_s15, 4  ;;  %p237_p0 = scmp.ne.s32.totalorder %s351_s1, %s236_s19  ;;  %s19_s16 = int_to_ptr.vmem [resolvable:$true] %s18_s16 }
   0x3   :  { %p240_p1 = scmp.lt.u32.totalorder %s236_s19, %s351_s1 }
   0x5   :  { %p242_p2 = pnand %p240_p1, %p237_p0 }
   0x7   :  { %245 = shalt.err (!%p242_p2)
}
   0x8   :  { %s246_s24 = scalar_lea.vmem %s19_s16, 2048  ;;  %p251_p4 = scmp.lt.s32.totalorder %s19_s16, %s19_s16 }
   0x9   :  { %p247_p3 = scmp.ne.s32.totalorder %s19_s16, %s246_s24  ;;  %p252_p5 = scmp.lt.s32.totalorder %s246_s24, %s246_s24 }
   0xb   :  { %p253_p6 = por %p252_p5, %p251_p4 }
   0xd   :  { %p254_p7 = pnand %p253_p6, %p247_p3 }
   0xf   :  { %257 = shalt.err (!%p254_p7)
}
  0x10   :  { %s285_s25 = smov 128   ;;  %s286_s26 = smov 8  }
  0x11   :  { %24 = dma.hbm_to_vmem [thread:$0]  %s351_s1, 2048, %s19_s16, [#allocation3], %s285_s25, %s285_s25, %s286_s26  }
  0x12   :  { %280 = dma.done.wait [#allocation3], 2048  }
  0x13   :  { %281 = vsyncadd [#allocation3], 4294965248  ;;  %v287_v0 = vmov 0.0|0.0   ;;  %vm288_vm0 = vmmov 0   ;;  %v289_v1 = vmov 0.0   ;;  %v290_v2 = vmov 0  }
  0x14   :  { %203 = vmatprep.subr.bf16.mxu0 %v287_v0  ;;  %200 = vmatprep.mubr.msk.f32.mxu0 %vm288_vm0, %v289_v1  ;;  %v33_v3 = vld [vmem:[#allocation2] sm:$0xff]  ;;  %v34_v4 = vld [vmem:[#allocation2 + $0x8] sm:$0xff]  ;;  %v35_v6 = vld [vmem:[#allocation2 + $0x10] sm:$0xff]  ;;  %s291_s7 = smov [#allocation5]  }
  0x15   :  { %235 = vset.pattern.permute.xlu0 %v290_v2  ;;  %v204_v5 = vpack.c.bf16 %v34_v4, %v33_v3  ;;  %v36_v7 = vld [vmem:[#allocation2 + $0x18] sm:$0xff]  ;;  %v127_v8 = vld [vmem:[%s352_s2] sm:$0xff]  ;;  %v38_v11 = vld [vmem:[#allocation2 + $0x28] sm:$0xff]  ;;  %s141_s8 = sshll.u32 %s291_s7, 4  ;;  %s142_s8 = int_to_ptr.vmem [resolvable:$true] %s141_s8 }
  0x16   :  { %130 = vperm.xlu0 %235, %v127_v8   ;;  %v207_v9 = vpack.c.bf16 %v36_v7, %v35_v6  ;;  %v37_v10 = vld [vmem:[#allocation2 + $0x20] sm:$0xff]  ;;  %v39_v13 = vld [vmem:[#allocation2 + $0x30] sm:$0xff]  ;;  %v40_v14 = vld [vmem:[#allocation2 + $0x38] sm:$0xff]  ;;  %s258_s9 = scalar_lea.vmem %s142_s8, 128  ;;  %p263_p9 = scmp.lt.s32.totalorder %s142_s8, %s142_s8 }
  0x17   :  { %205 = vmatpush3.bf16.xpose.msra.mxu0 %v204_v5  ;;  %v210_v12 = vpack.c.bf16 %v38_v11, %v37_v10  ;;  %v213_v15 = vpack.c.bf16 %v40_v14, %v39_v13  ;;  %v41_v16 = vld [vmem:[#allocation2 + $0x40] sm:$0xff]  ;;  %v42_v17 = vld [vmem:[#allocation2 + $0x48] sm:$0xff]  ;;  %v43_v19 = vld [vmem:[#allocation2 + $0x50] sm:$0xff]  ;;  %p259_p8 = scmp.ne.s32.totalorder %s142_s8, %s258_s9  ;;  %p264_p10 = scmp.lt.s32.totalorder %s258_s9, %s258_s9 }
  0x18   :  { %206 = vmatprep.subr.bf16.mxu0 %v287_v0  ;;  %v216_v18 = vpack.c.bf16 %v42_v17, %v41_v16  ;;  %v44_v20 = vld [vmem:[#allocation2 + $0x58] sm:$0xff]  ;;  %v45_v22 = vld [vmem:[#allocation2 + $0x60] sm:$0xff]  ;;  %v46_v23 = vld [vmem:[#allocation2 + $0x68] sm:$0xff] }
  0x19   :  { %v219_v21 = vpack.c.bf16 %v44_v20, %v43_v19  ;;  %v222_v24 = vpack.c.bf16 %v46_v23, %v45_v22  ;;  %v47_v25 = vld [vmem:[#allocation2 + $0x70] sm:$0xff]  ;;  %v48_v26 = vld [vmem:[#allocation2 + $0x78] sm:$0xff]  ;;  %v32_v28 = vld [vmem:[%s350_s0] sm:$0xff]  ;;  %p265_p11 = por %p264_p10, %p263_p9 }
  0x1a   :  { %v225_v27 = vpack.c.bf16 %v48_v26, %v47_v25  ;;  %v150_v29 = vld [vmem:[%s353_s3] ss:$0 sm:$0xff] }
  0x1b   :  { %p266_p12 = pnand %p265_p11, %p259_p8 }
  0x1f   :  { %208 = vmatpush3.bf16.xpose.msra.mxu0 %v207_v9 }
  0x20   :  { %209 = vmatprep.subr.bf16.mxu0 %v287_v0 }
  0x27   :  { %211 = vmatpush3.bf16.xpose.msra.mxu0 %v210_v12 }
  0x28   :  { %212 = vmatprep.subr.bf16.mxu0 %v287_v0 }
  0x2f   :  { %214 = vmatpush3.bf16.xpose.msra.mxu0 %v213_v15 }
  0x30   :  { %215 = vmatprep.subr.bf16.mxu0 %v287_v0 }
  0x37   :  { %217 = vmatpush3.bf16.xpose.msra.mxu0 %v216_v18 }
  0x38   :  { %218 = vmatprep.subr.bf16.mxu0 %v287_v0 }
  0x3f   :  { %220 = vmatpush3.bf16.xpose.msra.mxu0 %v219_v21 }
  0x40   :  { %221 = vmatprep.subr.bf16.mxu0 %v287_v0 }
  0x47   :  { %223 = vmatpush3.bf16.xpose.msra.mxu0 %v222_v24 }
  0x48   :  { %224 = vmatprep.subr.bf16.mxu0 %v287_v0 }
  0x4f   :  { %226 = vmatpush3.bf16.xpose.msra.mxu0 %v225_v27 }
  0x56   :  { %201 = vmatmul.mubr.f32.vlgmr.msra.gmra.mrb[0].mxu0 %v32_v28 }
  0x95   :  { %v131_v31 = vpop.permute.xlu0 %130 }
 0x129   :  { %v115_v30 = vpop.f32.mrb[0].mxu0 }
 0x12a   :  { %v126_v32 = vmul.f32 %v150_v29, %v115_v30  ;;  %v202_v33 = vpop.f32.mrb[1].mxu0 }
 0x12c   :  { %v133_v34 = vmul.f32 %v131_v31, %v126_v32 }
 0x12e   :  { %134 = vst [vmem:[#allocation5] sm:$0xff] %v133_v34 }
 0x12f   :  { %269 = shalt.err (!%p266_p12)
}
 0x130   :  { %s270_s3 = scalar_lea.hbm %s354_s4, 128 }
 0x131   :  { %p271_p13 = scmp.ne.s32.totalorder %s354_s4, %s270_s3  ;;  %p274_p0 = scmp.lt.u32.totalorder %s270_s3, %s354_s4 }
 0x133   :  { %p276_p1 = pnand %p274_p0, %p271_p13 }
 0x135   :  { %279 = shalt.err (!%p276_p1)
}
 0x136   :  { %144 = dma.vmem_to_hbm [thread:$0]  %s142_s8, 128, %s354_s4, [#allocation4]  }
 0x137   :  { %282 = dma.done.wait [#allocation4], 128  }
 0x138   :  { %283 = vsyncadd [#allocation4], 4294967168 }
 0x139   :  { %148 = vsyncpa [#allocation3], 1 }
 0x13a   :  { %149 = vsyncpa [#allocation4], 1 }

</bundles_post_ra>
